<compile_context>
chip_gen: v7x
topology: tpu7x:2x2x1
jax: 0.10.0
libtpu: 0.0.40
codegen_flags: <defaults>
</compile_context>

<pallas_src>
import functools
import math
from typing import NamedTuple

import jax
import jax.numpy as jnp
from jax.experimental import pallas as pl
from jax.experimental.pallas import tpu as pltpu


# --------------------------------------------------------------------------
# Kernels
# --------------------------------------------------------------------------
def _linear_kernel_2d(*refs, has_bias, compute_dtype):
    """Single-K-tile path: one dot per output tile, bias added in-register."""
    if has_bias:
        x_ref, w_ref, b_ref, o_ref = refs
    else:
        x_ref, w_ref, o_ref = refs
        b_ref = None
    x = x_ref[...]
    w = w_ref[...]
    if compute_dtype is not None:
        x = x.astype(compute_dtype)
        w = w.astype(compute_dtype)
    acc = jnp.dot(x, w, preferred_element_type=jnp.float32)  # (tm,tk)@(tk,tn)
    if has_bias:
        acc = acc + b_ref[...].astype(jnp.float32)
    o_ref[...] = acc.astype(o_ref.dtype)


def _linear_kernel_3d(*refs, has_bias, compute_dtype):
    """K-loop path: f32 VMEM accumulator, K is the innermost ('arbitrary') axis."""
    if has_bias:
        x_ref, w_ref, b_ref, o_ref, acc_ref = refs
    else:
        x_ref, w_ref, o_ref, acc_ref = refs
        b_ref = None
    kk = pl.program_id(2)

    x = x_ref[...]
    w = w_ref[...]
    if compute_dtype is not None:
        x = x.astype(compute_dtype)
        w = w.astype(compute_dtype)
    prod = jnp.dot(x, w, preferred_element_type=jnp.float32)

    @pl.when(kk == 0)
    def _():
        acc_ref[...] = prod          # write, don't zero-init + accumulate

    @pl.when(kk != 0)
    def _():
        acc_ref[...] += prod

    @pl.when(kk == pl.num_programs(2) - 1)
    def _():
        acc = acc_ref[...]
        if has_bias:
            acc = acc + b_ref[...].astype(jnp.float32)
        o_ref[...] = acc.astype(o_ref.dtype)


# --------------------------------------------------------------------------
# Tiling / hardware configuration helpers (all static, trace-time Python)
# --------------------------------------------------------------------------
class _TpuCfg(NamedTuple):
    tm: int
    tn: int
    tk: int
    align: int
    vmem_limit_bytes: int


@functools.lru_cache(maxsize=None)
def _tpu_config() -> _TpuCfg:
    """Generation-aware defaults. Conservative fallback works on every TPU."""
    vmem_bytes = None
    try:
        vmem_bytes = int(pltpu.get_tpu_info().vmem_capacity_bytes)
    except Exception:
        vmem_bytes = None
    if vmem_bytes is not None and vmem_bytes > 64 * 1024 * 1024:
        # v5e / v6e: 128 MiB VMEM, single TensorCore -> big tiles, big limit.
        return _TpuCfg(tm=512, tn=1024, tk=1024, align=128,
                       vmem_limit_bytes=96 * 1024 * 1024)
    # v7x (64 MiB VMEM per TC, 2x256x256 MXU) or unknown: 256-aligned, modest limit.
    return _TpuCfg(tm=512, tn=512, tk=512, align=256,
                   vmem_limit_bytes=40 * 1024 * 1024)


def _round_up(x, m):
    return (x + m - 1) // m * m


def _sublane(dtype):
    """Sublane-packing multiple for the second-to-last dim."""
    return max(8, 32 // jnp.dtype(dtype).itemsize)   # f32:8, bf16:16, int8:32


def _pick_tile(dim, max_tile, align):
    """Return (tile, padded_dim).

    * dim fits one tile  -> full-extent block, zero padding.
    * otherwise          -> largest `align`-multiple divisor of the aligned dim
                            (no weight pad for 128/256-aligned transformer dims).
    * degenerate divisor -> pad up to a multiple of max_tile rather than
                            running tiny 128-wide tiles (review item).
    """
    if dim <= max_tile:
        return dim, dim
    align = min(align, max_tile)
    padded = _round_up(dim, align)
    t = (max_tile // align) * align
    while t > align and padded % t != 0:
        t -= align
    if padded % t == 0 and t >= max_tile // 4:
        return t, padded
    return max_tile, _round_up(dim, max_tile)


# --------------------------------------------------------------------------
# Host-side wrappers
# --------------------------------------------------------------------------
@functools.partial(jax.jit, static_argnames=("compute_dtype", "tm", "tn", "tk"))
def linear_kn(x, w_kn, bias=None, *, compute_dtype=None, tm=None, tn=None, tk=None):
    """y = x @ w_kn + bias with w_kn already in (in_features, out_features) layout.

    This is the fast path: keep the weight stored transposed so no per-call
    transpose/copy is needed and the MXU sees a canonical (tm,tk)x(tk,tn) feed.
    """
    k, n = w_kn.shape
    assert x.shape[-1] == k, "input feature dim must match weight"

    lead = x.shape[:-1]
    m = math.prod(lead) if lead else 1
    x2d = x.reshape(m, k)

    cfg = _tpu_config()
    tm = cfg.tm if tm is None else tm
    tn = cfg.tn if tn is None else tn
    tk = cfg.tk if tk is None else tk

    # ---- static tile selection (shapes are trace-time constants) ----
    sub = _sublane(x.dtype)
    tm_eff = min(tm, _round_up(m, sub))
    m_pad = _round_up(m, tm_eff)
    tn_eff, n_pad = _pick_tile(n, tn, cfg.align)
    tk_eff, k_pad = _pick_tile(k, tk, cfg.align)

    # v7x has 2 TensorCores: keep >= 2 parallel output tiles for small-M shapes.
    if (m_pad // tm_eff) * (n_pad // tn_eff) == 1:
        half = tn_eff // 2
        if half >= 128 and half % 128 == 0 and n_pad % half == 0:
            tn_eff = half

    # Minimal zero-padding, applied only when a dim does not divide its tile.
    # For 128/256-aligned transformer dims the weight is never touched here.
    if m_pad != m or k_pad != k:
        x2d = jnp.pad(x2d, ((0, m_pad - m), (0, k_pad - k)))
    if n_pad != n or k_pad != k:
        w_kn = jnp.pad(w_kn, ((0, k_pad - k), (0, n_pad - n)))

    grid_m, grid_n, grid_k = m_pad // tm_eff, n_pad // tn_eff, k_pad // tk_eff
    has_bias = bias is not None

    o_shape = jax.ShapeDtypeStruct((m_pad, n_pad), x.dtype)
    compiler_params = pltpu.CompilerParams(
        dimension_semantics=(("parallel", "parallel")
                             if grid_k == 1
                             else ("parallel", "parallel", "arbitrary")),
        vmem_limit_bytes=cfg.vmem_limit_bytes,
    )

    operands = [x2d, w_kn]
    if has_bias:
        b2d = bias.reshape(1, n).astype(bias.dtype)
        if n_pad != n:
            b2d = jnp.pad(b2d, ((0, 0), (0, n_pad - n)))
        operands.append(b2d)

    if grid_k == 1:
        # -------- 2-D grid fast path: no K loop, no scratch, all parallel ----
        in_specs = [
            pl.BlockSpec((tm_eff, k_pad), lambda i, j: (i, 0)),
            pl.BlockSpec((k_pad, tn_eff), lambda i, j: (0, j)),
        ]
        if has_bias:
            in_specs.append(pl.BlockSpec((1, tn_eff), lambda i, j: (0, j)))
        out = pl.pallas_call(
            functools.partial(_linear_kernel_2d, has_bias=has_bias,
                              compute_dtype=compute_dtype),
            out_shape=o_shape,
            grid_spec=pltpu.PrefetchScalarGridSpec(
                num_scalar_prefetch=0,
                grid=(grid_m, grid_n),
                in_specs=in_specs,
                out_specs=pl.BlockSpec((tm_eff, tn_eff), lambda i, j: (i, j)),
            ),
            compiler_params=compiler_params,
        )(*operands)
    else:
        # -------- 3-D grid: K innermost ('arbitrary') with f32 accumulator ---
        in_specs = [
            pl.BlockSpec((tm_eff, tk_eff), lambda i, j, kk: (i, kk)),
            pl.BlockSpec((tk_eff, tn_eff), lambda i, j, kk: (kk, j)),
        ]
        if has_bias:
            in_specs.append(pl.BlockSpec((1, tn_eff), lambda i, j, kk: (0, j)))
        out = pl.pallas_call(
            functools.partial(_linear_kernel_3d, has_bias=has_bias,
                              compute_dtype=compute_dtype),
            out_shape=o_shape,
            grid_spec=pltpu.PrefetchScalarGridSpec(
                num_scalar_prefetch=0,
                grid=(grid_m, grid_n, grid_k),
                in_specs=in_specs,
                out_specs=pl.BlockSpec((tm_eff, tn_eff), lambda i, j, kk: (i, j)),
                scratch_shapes=[pltpu.VMEM((tm_eff, tn_eff), jnp.float32)],
            ),
            compiler_params=compiler_params,
        )(*operands)

    out = out[:m, :n]
    return out.reshape(*lead, n)


def linear(x, weight, bias=None, *, compute_dtype=None, tm=None, tn=None, tk=None):
    """torch.nn.functional.linear: y = x @ weight.T + bias (torch-layout weight).

    The (out, in) weight is transposed to (in, out) here. In a real model store
    the weight pre-transposed and call `linear_kn` directly so this transpose
    happens once at parameter-load time, not per forward call.
    """
    return linear_kn(x, weight.T, bias, compute_dtype=compute_dtype,
                     tm=tm, tn=tn, tk=tk)


# --------------------------------------------------------------------------
# Self-test
# --------------------------------------------------------------------------
if __name__ == "__main__":
    key = jax.random.PRNGKey(0)
    kx, kw, kb, kx2, kw2 = jax.random.split(key, 5)

    # ---- Case A/B: small layer, single-K-tile (2-D grid) path, f32 exact ----
    batch, seq, in_features, out_features = 2, 8, 32, 64
    bound = 1.0 / (in_features ** 0.5)
    weight = jax.random.uniform(kw, (out_features, in_features), jnp.float32,
                                -bound, bound)
    bias = jax.random.uniform(kb, (out_features,), jnp.float32, -bound, bound)
    x = jax.random.normal(kx, (batch, seq, in_features), jnp.float32)

    y = jax.block_until_ready(linear(x, weight, bias))
    y_ref = x @ weight.T + bias
    assert y.shape == (batch, seq, out_features)
    assert jnp.allclose(y, y_ref, atol=1e-4, rtol=1e-4)

    y_nb = jax.block_until_ready(linear(x, weight, None))
    assert jnp.allclose(y_nb, x @ weight.T, atol=1e-4, rtol=1e-4)

    # ---- Case C: force the K-loop accumulator (3-D grid) path ----
    in2, out2 = 256, 128
    bound2 = 1.0 / (in2 ** 0.5)
    w2 = jax.random.uniform(kw2, (out2, in2), jnp.float32, -bound2, bound2)
    x2 = jax.random.normal(kx2, (batch, seq, in2), jnp.float32)
    w2_kn = jnp.asarray(w2.T)  # pre-transposed once, the recommended hot path
    y2 = jax.block_until_ready(linear_kn(x2, w2_kn, None, tk=128))
    assert y2.shape == (batch, seq, out2)
    assert jnp.allclose(y2, x2 @ w2.T, atol=1e-4, rtol=1e-4)

    # ---- Case D: bf16 MXU compute with f32 accumulation (looser tolerance) ----
    y_bf = jax.block_until_ready(linear(x, weight, bias,
                                        compute_dtype=jnp.bfloat16))
    assert jnp.allclose(y_bf, y_ref, atol=3e-2, rtol=3e-2)

    print("KERNEL_OK")
</pallas_src>

<mosaic_0001>
module attributes {stable_mosaic.version = 11 : i64} {
  func.func @_linear_kernel_2d(%arg0: i32, %arg1: i32, %arg2: memref<16x32xf32, #tpu.memory_space<vmem>>, %arg3: memref<32x64xf32, #tpu.memory_space<vmem>>, %arg4: memref<1x64xf32, #tpu.memory_space<vmem>>, %arg5: memref<16x64xf32, #tpu.memory_space<vmem>>) attributes {dimension_semantics = [#tpu.dimension_semantics<parallel>, #tpu.dimension_semantics<parallel>], iteration_bounds = array<i64: 1, 1>, scalar_prefetch = 0 : i64, scratch_operands = 0 : i64, tpu.core_type = #tpu.core_type<tc>, window_params = [{transform_indices = @transform_0, window_bounds = array<i64: 16, 32>}, {transform_indices = @transform_1, window_bounds = array<i64: 32, 64>}, {transform_indices = @transform_2, window_bounds = array<i64: 1, 64>}, {transform_indices = @transform_3, window_bounds = array<i64: 16, 64>}]} {
    %c0 = arith.constant 0 : index
    %c0_0 = arith.constant 0 : index
    %0 = vector.load %arg2[%c0, %c0_0] : memref<16x32xf32, #tpu.memory_space<vmem>>, vector<16x32xf32>
    %c0_1 = arith.constant 0 : index
    %c0_2 = arith.constant 0 : index
    %1 = vector.load %arg3[%c0_1, %c0_2] : memref<32x64xf32, #tpu.memory_space<vmem>>, vector<32x64xf32>
    %cst = arith.constant dense<0.000000e+00> : vector<16x64xf32>
    %2 = tpu.matmul %0, %1, %cst {dimension_numbers = #tpu.dot_dimension_numbers<[1], [0], [0], [1], [0, 0, 1, 1], [], []>} : vector<16x32xf32>, vector<32x64xf32>, vector<16x64xf32> -> vector<16x64xf32>
    %c0_3 = arith.constant 0 : index
    %c0_4 = arith.constant 0 : index
    %3 = vector.load %arg4[%c0_3, %c0_4] : memref<1x64xf32, #tpu.memory_space<vmem>>, vector<1x64xf32>
    %4 = vector.broadcast %3 : vector<1x64xf32> to vector<16x64xf32>
    %5 = arith.addf %2, %4 : vector<16x64xf32>
    %c0_5 = arith.constant 0 : index
    %c0_6 = arith.constant 0 : index
    %6 = vector.load %arg5[%c0_5, %c0_6] : memref<16x64xf32, #tpu.memory_space<vmem>>, vector<16x64xf32>
    tpu.vector_store %arg5[%c0_5, %c0_6], %5 {strides = array<i32>} : memref<16x64xf32, #tpu.memory_space<vmem>>, vector<16x64xf32>,
    return
  }
  func.func @transform_0(%arg0: i32, %arg1: i32) -> (i32, i32) {
    %c0_i32 = arith.constant 0 : i32
    %c0_i32_0 = arith.constant 0 : i32
    return %arg0, %c0_i32 : i32, i32
  }
  func.func @transform_1(%arg0: i32, %arg1: i32) -> (i32, i32) {
    %c0_i32 = arith.constant 0 : i32
    %c0_i32_0 = arith.constant 0 : i32
    return %c0_i32, %arg1 : i32, i32
  }
  func.func @transform_2(%arg0: i32, %arg1: i32) -> (i32, i32) {
    %c0_i32 = arith.constant 0 : i32
    %c0_i32_0 = arith.constant 0 : i32
    return %c0_i32, %arg1 : i32, i32
  }
  func.func @transform_3(%arg0: i32, %arg1: i32) -> (i32, i32) {
    %c0_i32 = arith.constant 0 : i32
    return %arg0, %arg1 : i32, i32
  }
}

</mosaic_0001>

<bundles_post_ra>
// kernel: linear_kn.1
= control target key start
LH: loop header
LB: loop body
LE: loop exit
PB: predicated region body
PF: predicated region fallthrough
CT: control target
= control target key end

     0   :  { %8 = vsyncpa [#allocation3], 0  ;;  %s337_s0 = inlined_call_operand.hbm [shape: f32[16,32], index: 0, kind: input, shape index: {}]   ;;  %s338_s1 = inlined_call_operand.hbm [shape: f32[32,64], index: 1, kind: input, shape index: {}]   ;;  %s339_s2 = inlined_call_operand.vmem [shape: f32[1,64], index: 2, kind: input, shape index: {}]   ;;  %s340_s3 = inlined_call_operand.hbm [shape: f32[16,64], index: 3, kind: output, shape index: {}]  }
   0x1   :  { %9 = vsyncpa [#allocation6], 0 }
   0x2   :  { %10 = vsyncpa [#allocation4], 0  ;;  %s264_s12 = smov [#allocation2]   ;;  %s192_s16 = scalar_lea.hbm %s337_s0, 256 }
   0x3   :  { %s16_s13 = sshll.u32 %s264_s12, 4  ;;  %p193_p0 = scmp.ne.s32.totalorder %s337_s0, %s192_s16  ;;  %s17_s13 = int_to_ptr.vmem [resolvable:$true] %s16_s13 }
   0x4   :  { %p196_p1 = scmp.lt.u32.totalorder %s192_s16, %s337_s0 }
   0x6   :  { %p198_p2 = pnand %p196_p1, %p193_p0 }
   0x8   :  { %201 = shalt.err (!%p198_p2)
}
   0x9   :  { %s202_s21 = scalar_lea.vmem %s17_s13, 256  ;;  %p207_p4 = scmp.lt.s32.totalorder %s17_s13, %s17_s13 }
   0xa   :  { %p203_p3 = scmp.ne.s32.totalorder %s17_s13, %s202_s21  ;;  %p208_p5 = scmp.lt.s32.totalorder %s202_s21, %s202_s21 }
   0xc   :  { %p209_p6 = por %p208_p5, %p207_p4 }
   0xe   :  { %p210_p7 = pnand %p209_p6, %p203_p3 }
  0x10   :  { %213 = shalt.err (!%p210_p7)
}
  0x11   :  { %s265_s22 = smov 128   ;;  %s266_s23 = smov 8  }
  0x12   :  { %22 = dma.hbm_to_vmem [thread:$0]  %s337_s0, 256, %s17_s13, [#allocation3], %s265_s22, %s265_s22, %s266_s23  }
  0x13   :  { %s267_s26 = smov [#allocation5]   ;;  %s214_s30 = scalar_lea.hbm %s338_s1, 512 }
  0x14   :  { %s28_s27 = sshll.u32 %s267_s26, 4  ;;  %p215_p8 = scmp.ne.s32.totalorder %s338_s1, %s214_s30  ;;  %s29_s27 = int_to_ptr.vmem [resolvable:$true] %s28_s27 }
  0x15   :  { %p218_p9 = scmp.lt.u32.totalorder %s214_s30, %s338_s1 }
  0x17   :  { %p220_p10 = pnand %p218_p9, %p215_p8 }
  0x19   :  { %223 = shalt.err (!%p220_p10)
}
  0x1a   :  { %s224_s8 = scalar_lea.vmem %s29_s27, 512  ;;  %p229_p12 = scmp.lt.s32.totalorder %s29_s27, %s29_s27 }
  0x1b   :  { %p225_p11 = scmp.ne.s32.totalorder %s29_s27, %s224_s8  ;;  %p230_p13 = scmp.lt.s32.totalorder %s224_s8, %s224_s8 }
  0x1d   :  { %p231_p0 = por %p230_p13, %p229_p12 }
  0x1f   :  { %p232_p1 = pnand %p231_p0, %p225_p11 }
  0x21   :  { %235 = shalt.err (!%p232_p1)
}
  0x22   :  { %34 = dma.hbm_to_vmem [thread:$0]  %s338_s1, 512, %s29_s27, [#allocation6], %s265_s22, %s265_s22, %s266_s23  }
  0x23   :  { %258 = dma.done.wait [#allocation3], 256  }
  0x24   :  { %259 = vsyncadd [#allocation3], 4294967040 }
  0x25   :  { %260 = dma.done.wait [#allocation6], 512  }
  0x26   :  { %261 = vsyncadd [#allocation6], 4294966784  ;;  %vm56_vm0 = vcmask 261120   ;;  %v45_v0 = vld [vmem:[#allocation5] sm:$0xff]  ;;  %v46_v1 = vld [vmem:[#allocation5 + $0x8] sm:$0xff]  ;;  %s268_s11 = smov [#allocation7]  }
  0x27   :  { %v47_v2 = vld [vmem:[#allocation5 + $0x10] sm:$0xff]  ;;  %v179_v3 = vpack.c.bf16 %v46_v1, %v45_v0  ;;  %v48_v4 = vld [vmem:[#allocation5 + $0x18] sm:$0xff]  ;;  %s146_s12 = sshll.u32 %s268_s11, 4  ;;  %vm138_vm1 = vcmask 523264   ;;  %s147_s12 = int_to_ptr.vmem [resolvable:$true] %s146_s12 }
  0x28   :  { %v43_v5 = vld [vmem:[#allocation2] sm:$0xff]  ;;  %v183_v6 = vpack.c.bf16 %v48_v4, %v47_v2  ;;  %v44_v7 = vld [vmem:[#allocation2 + $0x8] sm:$0xff]  ;;  %s236_s13 = scalar_lea.vmem %s147_s12, 256  ;;  %p241_p3 = scmp.lt.s32.totalorder %s147_s12, %s147_s12 }
  0x29   :  { %176 = vmatprep.mubr.msk.f32.mxu0 %vm56_vm0, %v43_v5  ;;  %180 = vmatprep.subr.bf16.mxu0 %v179_v3  ;;  %v159_v8 = vld [vmem:[%s339_s2] ss:$0 sm:$0xff]  ;;  %p237_p2 = scmp.ne.s32.totalorder %s147_s12, %s236_s13  ;;  %p242_p4 = scmp.lt.s32.totalorder %s236_s13, %s236_s13 }
  0x2a   :  { %182 = vmatpush3.bf16.msra.mxu0 %v179_v3 }
  0x2b   :  { %184 = vmatprep.subr.bf16.mxu0 %v183_v6  ;;  %p243_p5 = por %p242_p4, %p241_p3 }
  0x2d   :  { %p244_p6 = pnand %p243_p5, %p237_p2 }
  0x2e   :  { %186 = vmatpush3.bf16.msra.mxu0 %v183_v6 }
  0x31   :  { %177 = vmatmul.mubr.msk.f32.vlgmr.msra.gmra.mrb[0].mxu0 %vm56_vm0, %v44_v7 }
 0x104   :  { %v178_v9 = vpop.f32.mrb[0].mxu0 }
 0x105   :  { %v135_v10 = vadd.f32 %v178_v9, %v159_v8  ;;  %v129_v11 = vpop.f32.mrb[1].mxu0 }
 0x106   :  { %v130_v12 = vadd.f32 %v159_v8, %v129_v11 }
 0x107   :  { %140 = vst.msk [vmem:[#allocation7 + $0x8] sm:$0xff] %vm138_vm1, %v135_v10 }
 0x108   :  { %139 = vst.msk [vmem:[#allocation7] sm:$0xff] %vm138_vm1, %v130_v12 }
 0x109   :  { %247 = shalt.err (!%p244_p6)
}
 0x10a   :  { %s248_s2 = scalar_lea.hbm %s340_s3, 256 }
 0x10b   :  { %p249_p7 = scmp.ne.s32.totalorder %s340_s3, %s248_s2  ;;  %p252_p8 = scmp.lt.u32.totalorder %s248_s2, %s340_s3 }
 0x10d   :  { %p254_p9 = pnand %p252_p8, %p249_p7 }
 0x10f   :  { %257 = shalt.err (!%p254_p9)
}
 0x110   :  { %152 = dma.vmem_to_hbm [thread:$0]  %s147_s12, 256, %s340_s3, [#allocation4], %s265_s22, %s265_s22, %s266_s23  }
 0x111   :  { %262 = dma.done.wait [#allocation4], 256  }
 0x112   :  { %263 = vsyncadd [#allocation4], 4294967040 }
 0x113   :  { %156 = vsyncpa [#allocation3], 1 }
 0x114   :  { %157 = vsyncpa [#allocation6], 1 }
 0x115   :  { %158 = vsyncpa [#allocation4], 1 }

</bundles_post_ra>
